<compile_context>
chip_gen: v7x
topology: tpu7x:2x2x1
jax: 0.10.0
libtpu: 0.0.40
codegen_flags: <defaults>
</compile_context>

<pallas_src>
import jax
import jax.numpy as jnp
from jax.experimental import pallas as pl
from jax.experimental.pallas import tpu as pltpu


# ----------------------------------------------------------------------------
# Kernel: one grid step == one GRU time step.  Hidden state lives in VMEM.
# ----------------------------------------------------------------------------
def _gru_seq_kernel(xy_ref, h0_ref, w_in_ref, w_h_ref, b_ref, out_ref, h_ref):
    """
    xy_ref:   (1, B, Dxy)  per-step [x_t | y_prev_t] (streamed)
    h0_ref:   (B, H)       initial hidden state (resident, read at t == 0)
    w_in_ref: (Dxy, 4H)    input rows, gate cols [r | z | n_i | 0]   (resident)
    w_h_ref:  (H, 4H)      hidden rows, gate cols [r | z | 0 | n_h]  (resident)
    b_ref:    (1, 1, 4H)   per-step effective bias (time columns folded in)
    out_ref:  (1, B, H)    hidden state after this step
    h_ref:    (B, H) f32   VMEM scratch carrying the hidden state across steps
    """
    t = pl.program_id(0)

    @pl.when(t == 0)
    def _():
        h_ref[...] = h0_ref[...].astype(jnp.float32)

    h = h_ref[...]                                   # (B, H) f32
    xy = xy_ref[0].astype(jnp.float32)               # (B, Dxy)

    # Single lane-dense (B, 4H) gate slab; two single-tile MXU pushes + one
    # bias add (which already carries the folded t_cur/t_prev/t_diff terms).
    g = (jnp.dot(xy, w_in_ref[...], preferred_element_type=jnp.float32)
         + jnp.dot(h, w_h_ref[...], preferred_element_type=jnp.float32)
         + b_ref[0])                                 # (1, 4H) broadcast

    H = h_ref.shape[1]
    r = jax.nn.sigmoid(g[:, 0 * H:1 * H])
    z = jax.nn.sigmoid(g[:, 1 * H:2 * H])
    n = jnp.tanh(g[:, 2 * H:3 * H] + r * g[:, 3 * H:4 * H])
    h_new = (1.0 - z) * n + z * h

    h_ref[...] = h_new
    out_ref[0] = h_new.astype(out_ref.dtype)


# ----------------------------------------------------------------------------
# Wrappers
# ----------------------------------------------------------------------------
def _effective_bias(packed, t_current, t_prev):
    """Fold the constant time columns into the bias.  Returns (T, 1, 4H)."""
    t_c = jnp.asarray(t_current, jnp.float32).reshape(-1, 1)   # (T, 1)
    t_p = jnp.asarray(t_prev, jnp.float32).reshape(-1, 1)
    w_t = packed["w_t"]                                        # (3, 4H)
    b = (packed["b"]
         + t_c * w_t[0][None, :]
         + t_p * w_t[1][None, :]
         + (t_c - t_p) * w_t[2][None, :])                      # (T, 4H)
    return b[:, None, :]


def rnn_encoder_sequence(h0, xs, ys, t_current, t_prev, packed):
    """Run T GRU-encoder steps in a single pallas_call.

    h0: (B, H);  xs: (T, B, x_dim);  ys: (T, B, y_dim);
    t_current, t_prev: (T,) per-step scalars.
    Returns the hidden state after every step: (T, B, H).
    """
    T, B, _ = xs.shape
    H = h0.shape[1]
    xy = jnp.concatenate([xs, ys], axis=-1)                    # once per sequence
    Dxy = xy.shape[-1]
    eff_b = _effective_bias(packed, t_current, t_prev)         # (T, 1, 4H)

    return pl.pallas_call(
        _gru_seq_kernel,
        out_shape=jax.ShapeDtypeStruct((T, B, H), h0.dtype),
        grid=(T,),
        in_specs=[
            pl.BlockSpec((1, B, Dxy), lambda t: (t, 0, 0)),    # streamed x/y
            pl.BlockSpec((B, H), lambda t: (0, 0)),            # h0 (resident)
            pl.BlockSpec((Dxy, 4 * H), lambda t: (0, 0)),      # w_in (resident)
            pl.BlockSpec((H, 4 * H), lambda t: (0, 0)),        # w_h (resident)
            pl.BlockSpec((1, 1, 4 * H), lambda t: (t, 0, 0)),  # folded bias
        ],
        out_specs=pl.BlockSpec((1, B, H), lambda t: (t, 0, 0)),
        scratch_shapes=[pltpu.VMEM((B, H), jnp.float32)],      # carried hidden
        compiler_params=pltpu.CompilerParams(
            dimension_semantics=("arbitrary",)),               # time is sequential
    )(xy, h0, packed["w_in"], packed["w_h"], eff_b)


def rnn_encoder_forward(h, x_current, y_prev, t_current, t_prev, packed):
    """Pallas version of RNNEncoder.forward (encoder_network=None): one step."""
    out = rnn_encoder_sequence(
        h,
        x_current[None], y_prev[None],
        jnp.asarray(t_current, jnp.float32).reshape(1),
        jnp.asarray(t_prev, jnp.float32).reshape(1),
        packed)
    return out[0]


# ----------------------------------------------------------------------------
# Parameter init (PyTorch nn.GRUCell layout) and one-time repack
# ----------------------------------------------------------------------------
def init_gru_params(key, rnn_input_dim, hidden_dim, dtype=jnp.float32):
    """nn.GRUCell-shaped params: U(-1/sqrt(H), 1/sqrt(H)), gate order r|z|n."""
    k1, k2, k3, k4 = jax.random.split(key, 4)
    bound = 1.0 / float(hidden_dim) ** 0.5
    return {
        "w_ih": jax.random.uniform(k1, (3 * hidden_dim, rnn_input_dim), dtype, -bound, bound),
        "w_hh": jax.random.uniform(k2, (3 * hidden_dim, hidden_dim), dtype, -bound, bound),
        "b_ih": jax.random.uniform(k3, (3 * hidden_dim,), dtype, -bound, bound),
        "b_hh": jax.random.uniform(k4, (3 * hidden_dim,), dtype, -bound, bound),
    }


def pack_gru_params(params, num_xy, hidden_dim, dtype=jnp.float32):
    """One-time repack of PyTorch GRUCell params into the kernel layout.

    Gate columns: [r | z | n_from_input | n_from_hidden] (width 4H, lane-dense
    when H == 32).  The 3 trailing input rows (t_cur, t_prev, t_diff) are kept
    separately (w_t) so they can be folded into the bias.
    # TODO(synk): set dtype=jnp.bfloat16 here to halve weight DMA bytes if the
    # model tolerates it (gate math stays f32 in the kernel).
    """
    H = hidden_dim
    w_ih_t = params["w_ih"].T.astype(dtype)          # (D_in, 3H), cols [r|z|n]
    w_hh_t = params["w_hh"].T.astype(dtype)          # (H,    3H)
    b_ih = params["b_ih"].astype(dtype)
    b_hh = params["b_hh"].astype(dtype)

    w_in = jnp.concatenate(
        [w_ih_t[:num_xy], jnp.zeros((num_xy, H), dtype)], axis=1)                  # (Dxy, 4H)
    w_t = jnp.concatenate(
        [w_ih_t[num_xy:num_xy + 3], jnp.zeros((3, H), dtype)], axis=1)             # (3, 4H)
    w_h = jnp.concatenate(
        [w_hh_t[:, :2 * H], jnp.zeros((H, H), dtype), w_hh_t[:, 2 * H:]], axis=1)  # (H, 4H)
    b = jnp.concatenate(
        [b_ih[:2 * H] + b_hh[:2 * H], b_ih[2 * H:], b_hh[2 * H:]])[None, :]        # (1, 4H)
    return {"w_in": w_in, "w_t": w_t, "w_h": w_h, "b": b}


# ----------------------------------------------------------------------------
# Pure-JAX references
# ----------------------------------------------------------------------------
def _reference_step(h, x, y, t_cur, t_prev, params):
    """PyTorch-form GRUCell step over cat([x, y, t_cur, t_prev, t_diff])."""
    B = x.shape[0]
    dt = x.dtype
    tc = jnp.full((B, 1), t_cur, dt)
    tp = jnp.full((B, 1), t_prev, dt)
    inp = jnp.concatenate([x, y, tc, tp, tc - tp], axis=1)
    H = h.shape[1]
    gi = inp @ params["w_ih"].T + params["b_ih"]
    gh = h @ params["w_hh"].T + params["b_hh"]
    r = jax.nn.sigmoid(gi[:, :H] + gh[:, :H])
    z = jax.nn.sigmoid(gi[:, H:2 * H] + gh[:, H:2 * H])
    n = jnp.tanh(gi[:, 2 * H:] + r * gh[:, 2 * H:])
    return (1.0 - z) * n + z * h


def _reference_sequence(h0, xs, ys, t_current, t_prev, params):
    hs, h = [], h0
    for t in range(xs.shape[0]):
        h = _reference_step(h, xs[t], ys[t], t_current[t], t_prev[t], params)
        hs.append(h)
    return jnp.stack(hs, axis=0)


def _packed_reference_sequence(h0, xs, ys, t_current, t_prev, packed):
    """Structure-matched reference (same summation structure as the kernel)."""
    xy = jnp.concatenate([xs, ys], axis=-1)
    eff_b = _effective_bias(packed, t_current, t_prev)[:, 0, :]
    H = h0.shape[1]
    hs, h = [], h0.astype(jnp.float32)
    for t in range(xs.shape[0]):
        g = (xy[t].astype(jnp.float32) @ packed["w_in"]
             + h @ packed["w_h"] + eff_b[t][None, :])
        r = jax.nn.sigmoid(g[:, :H])
        z = jax.nn.sigmoid(g[:, H:2 * H])
        n = jnp.tanh(g[:, 2 * H:3 * H] + r * g[:, 3 * H:4 * H])
        h = (1.0 - z) * n + z * h
        hs.append(h)
    return jnp.stack(hs, axis=0).astype(h0.dtype)


# ----------------------------------------------------------------------------
if __name__ == "__main__":
    key = jax.random.PRNGKey(0)
    kx, ky, kh, kp = jax.random.split(key, 4)

    batch = 4
    x_dim = 13
    y_dim = 16
    hidden_dim = 32                      # 4H == 128 -> lane-dense gate slab
    seq_len = 8
    rnn_input_dim = x_dim + y_dim + 3    # x | y_prev | t_cur | t_prev | t_diff

    xs = jax.random.normal(kx, (seq_len, batch, x_dim), jnp.float32)
    ys = jax.random.normal(ky, (seq_len, batch, y_dim), jnp.float32)
    h0 = jax.random.normal(kh, (batch, hidden_dim), jnp.float32)
    ts = jnp.linspace(0.0, 1.0, seq_len + 1, dtype=jnp.float32)
    t_prev, t_current = ts[:-1], ts[1:]

    params = init_gru_params(kp, rnn_input_dim, hidden_dim)
    packed = pack_gru_params(params, x_dim + y_dim, hidden_dim)   # done ONCE

    # Full recurrence in ONE pallas_call.
    hs = rnn_encoder_sequence(h0, xs, ys, t_current, t_prev, packed)
    hs = jax.block_until_ready(hs)
    assert hs.shape == (seq_len, batch, hidden_dim)

    # Structure-matched reference: tight tolerance (same operands/summation).
    hs_packed_ref = _packed_reference_sequence(h0, xs, ys, t_current, t_prev, packed)
    assert jnp.allclose(hs, hs_packed_ref, atol=1e-5, rtol=1e-5)

    # PyTorch-form reference: guards the repack / time-fold; looser tolerance
    # absorbs default MXU matmul-precision differences between the two
    # summation structures (still far tighter than any real bug).
    hs_ref = _reference_sequence(h0, xs, ys, t_current, t_prev, params)
    assert jnp.allclose(hs, hs_ref, atol=2e-3, rtol=2e-3)

    # Single step with the original RNNEncoder.forward signature.
    h1 = rnn_encoder_forward(h0, xs[0], ys[0], t_current[0], t_prev[0], packed)
    h1 = jax.block_until_ready(h1)
    h1_ref = _reference_step(h0, xs[0], ys[0], t_current[0], t_prev[0], params)
    assert h1.shape == (batch, hidden_dim)
    assert jnp.allclose(h1, hs[0], atol=1e-5, rtol=1e-5)
    assert jnp.allclose(h1, h1_ref, atol=2e-3, rtol=2e-3)

    print("KERNEL_OK")
</pallas_src>

<mosaic_0001>
module attributes {stable_mosaic.version = 11 : i64} {
  func.func @_gru_seq_kernel(%arg0: i32, %arg1: memref<1x4x29xf32, #tpu.memory_space<vmem>>, %arg2: memref<4x32xf32, #tpu.memory_space<vmem>>, %arg3: memref<29x128xf32, #tpu.memory_space<vmem>>, %arg4: memref<32x128xf32, #tpu.memory_space<vmem>>, %arg5: memref<1x1x128xf32, #tpu.memory_space<vmem>>, %arg6: memref<1x4x32xf32, #tpu.memory_space<vmem>>, %arg7: memref<4x32xf32, #tpu.memory_space<vmem>>) attributes {dimension_semantics = [#tpu.dimension_semantics<arbitrary>], iteration_bounds = array<i64: 8>, scalar_prefetch = 0 : i64, scratch_operands = 1 : i64, tpu.core_type = #tpu.core_type<tc>, window_params = [{transform_indices = @transform_0, window_bounds = array<i64: 1, 4, 29>}, {pipeline_mode = #tpu.pipeline_mode<synchronous>, transform_indices = @transform_1, window_bounds = array<i64: 4, 32>}, {pipeline_mode = #tpu.pipeline_mode<synchronous>, transform_indices = @transform_2, window_bounds = array<i64: 29, 128>}, {pipeline_mode = #tpu.pipeline_mode<synchronous>, transform_indices = @transform_3, window_bounds = array<i64: 32, 128>}, {transform_indices = @transform_4, window_bounds = array<i64: 1, 1, 128>}, {transform_indices = @transform_5, window_bounds = array<i64: 1, 4, 32>}]} {
    %c0_i32 = arith.constant 0 : i32
    %0 = arith.cmpi eq, %arg0, %c0_i32 : i32
    %1 = arith.extui %0 : i1 to i32
    %c0_i32_0 = arith.constant 0 : i32
    %2 = arith.cmpi ne, %1, %c0_i32_0 : i32
    scf.if %2 {
      %c0_21 = arith.constant 0 : index
      %c0_22 = arith.constant 0 : index
      %41 = vector.load %arg2[%c0_21, %c0_22] : memref<4x32xf32, #tpu.memory_space<vmem>>, vector<4x32xf32>
      %c0_23 = arith.constant 0 : index
      %c0_24 = arith.constant 0 : index
      %42 = vector.load %arg7[%c0_23, %c0_24] : memref<4x32xf32, #tpu.memory_space<vmem>>, vector<4x32xf32>
      tpu.vector_store %arg7[%c0_23, %c0_24], %41 {strides = array<i32>} : memref<4x32xf32, #tpu.memory_space<vmem>>, vector<4x32xf32>,
    } else {
    }
    %c0 = arith.constant 0 : index
    %c0_1 = arith.constant 0 : index
    %3 = vector.load %arg7[%c0, %c0_1] : memref<4x32xf32, #tpu.memory_space<vmem>>, vector<4x32xf32>
    %c0_2 = arith.constant 0 : index
    %c0_3 = arith.constant 0 : index
    %c0_4 = arith.constant 0 : index
    %4 = vector.load %arg1[%c0_2, %c0_3, %c0_4] : memref<1x4x29xf32, #tpu.memory_space<vmem>>, vector<1x4x29xf32>
    %5 = vector.shape_cast %4 : vector<1x4x29xf32> to vector<4x29xf32>
    %c0_5 = arith.constant 0 : index
    %c0_6 = arith.constant 0 : index
    %6 = vector.load %arg3[%c0_5, %c0_6] : memref<29x128xf32, #tpu.memory_space<vmem>>, vector<29x128xf32>
    %cst = arith.constant dense<0.000000e+00> : vector<4x128xf32>
    %7 = tpu.matmul %5, %6, %cst {dimension_numbers = #tpu.dot_dimension_numbers<[1], [0], [0], [1], [0, 0, 1, 1], [], []>} : vector<4x29xf32>, vector<29x128xf32>, vector<4x128xf32> -> vector<4x128xf32>
    %c0_7 = arith.constant 0 : index
    %c0_8 = arith.constant 0 : index
    %8 = vector.load %arg4[%c0_7, %c0_8] : memref<32x128xf32, #tpu.memory_space<vmem>>, vector<32x128xf32>
    %cst_9 = arith.constant dense<0.000000e+00> : vector<4x128xf32>
    %9 = tpu.matmul %3, %8, %cst_9 {dimension_numbers = #tpu.dot_dimension_numbers<[1], [0], [0], [1], [0, 0, 1, 1], [], []>} : vector<4x32xf32>, vector<32x128xf32>, vector<4x128xf32> -> vector<4x128xf32>
    %10 = arith.addf %7, %9 : vector<4x128xf32>
    %c0_10 = arith.constant 0 : index
    %c0_11 = arith.constant 0 : index
    %c0_12 = arith.constant 0 : index
    %11 = vector.load %arg5[%c0_10, %c0_11, %c0_12] : memref<1x1x128xf32, #tpu.memory_space<vmem>>, vector<1x1x128xf32>
    %12 = vector.shape_cast %11 : vector<1x1x128xf32> to vector<1x128xf32>
    %13 = vector.broadcast %12 : vector<1x128xf32> to vector<4x128xf32>
    %14 = arith.addf %10, %13 : vector<4x128xf32>
    %15 = vector.extract_strided_slice %14 {offsets = [0, 0], sizes = [4, 32], strides = [1, 1]} : vector<4x128xf32> to vector<4x32xf32>
    %16 = arith.negf %15 : vector<4x32xf32>
    %17 = math.exp %16 : vector<4x32xf32>
    %cst_13 = arith.constant 1.000000e+00 : f32
    %18 = vector.broadcast %cst_13 : f32 to vector<4x32xf32>
    %19 = arith.addf %18, %17 : vector<4x32xf32>
    %20 = arith.divf %18, %19 : vector<4x32xf32>
    %21 = vector.extract_strided_slice %14 {offsets = [0, 32], sizes = [4, 32], strides = [1, 1]} : vector<4x128xf32> to vector<4x32xf32>
    %22 = arith.negf %21 : vector<4x32xf32>
    %23 = math.exp %22 : vector<4x32xf32>
    %cst_14 = arith.constant 1.000000e+00 : f32
    %24 = vector.broadcast %cst_14 : f32 to vector<4x32xf32>
    %25 = arith.addf %24, %23 : vector<4x32xf32>
    %26 = arith.divf %24, %25 : vector<4x32xf32>
    %27 = vector.extract_strided_slice %14 {offsets = [0, 64], sizes = [4, 32], strides = [1, 1]} : vector<4x128xf32> to vector<4x32xf32>
    %28 = vector.extract_strided_slice %14 {offsets = [0, 96], sizes = [4, 32], strides = [1, 1]} : vector<4x128xf32> to vector<4x32xf32>
    %29 = arith.mulf %20, %28 : vector<4x32xf32>
    %30 = arith.addf %27, %29 : vector<4x32xf32>
    %31 = math.tanh %30 : vector<4x32xf32>
    %cst_15 = arith.constant 1.000000e+00 : f32
    %32 = vector.broadcast %cst_15 : f32 to vector<4x32xf32>
    %33 = arith.subf %32, %26 : vector<4x32xf32>
    %34 = arith.mulf %33, %31 : vector<4x32xf32>
    %35 = arith.mulf %26, %3 : vector<4x32xf32>
    %36 = arith.addf %34, %35 : vector<4x32xf32>
    %c0_16 = arith.constant 0 : index
    %c0_17 = arith.constant 0 : index
    %37 = vector.load %arg7[%c0_16, %c0_17] : memref<4x32xf32, #tpu.memory_space<vmem>>, vector<4x32xf32>
    tpu.vector_store %arg7[%c0_16, %c0_17], %36 {strides = array<i32>} : memref<4x32xf32, #tpu.memory_space<vmem>>, vector<4x32xf32>,
    %c0_18 = arith.constant 0 : index
    %c0_19 = arith.constant 0 : index
    %c0_20 = arith.constant 0 : index
    %38 = vector.load %arg6[%c0_18, %c0_19, %c0_20] : memref<1x4x32xf32, #tpu.memory_space<vmem>>, vector<1x4x32xf32>
    %39 = vector.shape_cast %38 : vector<1x4x32xf32> to vector<4x32xf32>
    %40 = vector.shape_cast %36 : vector<4x32xf32> to vector<1x4x32xf32>
    tpu.vector_store %arg6[%c0_18, %c0_19, %c0_20], %40 {strides = array<i32>} : memref<1x4x32xf32, #tpu.memory_space<vmem>>, vector<1x4x32xf32>,
    return
  }
  func.func @transform_0(%arg0: i32) -> (i32, i32, i32) {
    %c0_i32 = arith.constant 0 : i32
    %c0_i32_0 = arith.constant 0 : i32
    %c0_i32_1 = arith.constant 0 : i32
    return %arg0, %c0_i32, %c0_i32_0 : i32, i32, i32
  }
  func.func @transform_1(%arg0: i32) -> (i32, i32) {
    %c0_i32 = arith.constant 0 : i32
    %c0_i32_0 = arith.constant 0 : i32
    %c0_i32_1 = arith.constant 0 : i32
    return %c0_i32, %c0_i32_0 : i32, i32
  }
  func.func @transform_2(%arg0: i32) -> (i32, i32) {
    %c0_i32 = arith.constant 0 : i32
    %c0_i32_0 = arith.constant 0 : i32
    %c0_i32_1 = arith.constant 0 : i32
    return %c0_i32, %c0_i32_0 : i32, i32
  }
  func.func @transform_3(%arg0: i32) -> (i32, i32) {
    %c0_i32 = arith.constant 0 : i32
    %c0_i32_0 = arith.constant 0 : i32
    %c0_i32_1 = arith.constant 0 : i32
    return %c0_i32, %c0_i32_0 : i32, i32
  }
  func.func @transform_4(%arg0: i32) -> (i32, i32, i32) {
    %c0_i32 = arith.constant 0 : i32
    %c0_i32_0 = arith.constant 0 : i32
    %c0_i32_1 = arith.constant 0 : i32
    return %arg0, %c0_i32, %c0_i32_0 : i32, i32, i32
  }
  func.func @transform_5(%arg0: i32) -> (i32, i32, i32) {
    %c0_i32 = arith.constant 0 : i32
    %c0_i32_0 = arith.constant 0 : i32
    %c0_i32_1 = arith.constant 0 : i32
    return %arg0, %c0_i32, %c0_i32_0 : i32, i32, i32
  }
}

</mosaic_0001>

<bundles_post_ra>
// kernel: tpu_custom_call.1
= control target key start
LH: loop header
LB: loop body
LE: loop exit
PB: predicated region body
PF: predicated region fallthrough
CT: control target
= control target key end

     0   :  { %10 = vsyncpa [#allocation4], 0  ;;  %s1293_s0 = inlined_call_operand.hbm [shape: f32[8,4,29], index: 0, kind: input, shape index: {}]   ;;  %s1294_s1 = inlined_call_operand.hbm [shape: f32[4,32], index: 1, kind: input, shape index: {}]   ;;  %s1295_s2 = inlined_call_operand.hbm [shape: f32[29,128], index: 2, kind: input, shape index: {}]   ;;  %s1296_s3 = inlined_call_operand.hbm [shape: f32[32,128], index: 3, kind: input, shape index: {}]   ;;  %s1297_s4 = inlined_call_operand.vmem [shape: f32[8,1,128], index: 4, kind: input, shape index: {}]   ;;  %s1298_s5 = inlined_call_operand.hbm [shape: f32[8,4,32], index: 5, kind: output, shape index: {}]  }
   0x1   :  { %12 = vsyncpa [#allocation4 + $0x1], 0 }
   0x2   :  { %13 = vsyncpa [#allocation7], 0 }
   0x3   :  { %14 = vsyncpa [#allocation10], 0 }
   0x4   :  { %15 = vsyncpa [#allocation5], 0 }
   0x5   :  { %17 = vsyncpa [#allocation5 + $0x1], 0  ;;  %s1025_s18 = smov 0   ;;  %s1027_s19 = smov 0  }
   0x6   :  { %s1029_s20 = smov 0   ;;  %s1031_s21 = smov 0  }
   0x7 LB: > { %s1046_s22 = sadd.s32 4294967295, %s979_s21   ;;  %s630_s23 = sadd.s32 4294967294, %s979_s21   ;;  %s979_s21 = sphi %s1031_s21, %s1321_s21   ;;  %s975_s20 = sphi %s1029_s20, %s1320_s20   ;;  %s971_s19 = sphi %s1027_s19, %s1319_s19   ;;  %s967_s18 = sphi %s1025_s18, %s1318_s18  }
   0x8   : > { %p43_p0 = scmp.ne.s32.totalorder %s971_s19, %s967_s18  ;;  %p1299_p1 = scmp.eq.s32.totalorder %s1046_s22, 0 }
   0x9   : > { %p162_p3 = scmp.eq.s32.totalorder %s630_s23, 7  ;;  %p631_p5 = scmp.ge.s32.totalorder %s979_s21, 1 }
   0xa   : > { %p1055_p4 = por %p1299_p1, %p43_p0  ;;  %p169_p7 = scmp.lt.s32.totalorder %s979_s21, 9 }
   0xb   : > { %p1060_p6 = por %p162_p3, %p43_p0  ;;  %s981_s27 = smov [#allocation6]  }
   0xc   : > { %s1302_s24 = scalar_select %p1055_p4, 1, 0 }
   0xd   : > { %s1303_s25 = scalar_select %p1060_p6, 1, 0 }
   0xe   : > { %p1066_p9 = pnand %p631_p5, %p169_p7  ;;  %s182_s28 = sshll.u32 %s981_s27, 4  ;;  %s183_s28 = int_to_ptr.vmem [resolvable:$true] %s182_s28 }
   0xf   : > { %s982_s29 = smov [#allocation8]   ;;  %s983_s7 = smov [#allocation9]  }
  0x10   : > { %s1304_s26 = scalar_select %p1066_p9, 1, 0 }
  0x11   : > { %p715_p10 = pneg %p1066_p9  ;;  %s192_s30 = sshll.u32 %s982_s29, 4  ;;  %s1078_s30 = int_to_ptr.vmem [resolvable:$true] %s192_s30 }
  0x12   : > { %s1080_s8 = sshll.u32 %s983_s7, 4  ;;  %s791_s11 = scalar_lea.hbm %s1294_s1, 64  ;;  %s206_s8 = int_to_ptr.vmem [resolvable:$true] %s1080_s8 }
  0x13   : > { %p1074_p11 = pnand %p715_p10, %p1299_p1  ;;  %p792_p12 = scmp.ne.s32.totalorder %s1294_s1, %s791_s11 }
  0x14   : > { %p798_p5 = scmp.lt.u32.totalorder %s791_s11, %s1294_s1 }
  0x15   : > { %p1090_p13 = pneg %p1074_p11 }
  0x17   : > { %p794_p0 = pnand %p1090_p13, %p792_p12 }
  0x19   : > { %p795_p3 = pneg %p794_p0 }
  0x1b   : > { %p800_p7 = pnand %p798_p5, %p795_p3 }
  0x1d   : > { %803 = shalt.err (!%p800_p7)
}
  0x1e   : > { %s804_s17 = scalar_lea.vmem %s183_s28, 64  ;;  %p812_p2 = scmp.lt.s32.totalorder %s183_s28, %s183_s28 }
  0x1f   : > { %p805_p10 = scmp.ne.s32.totalorder %s183_s28, %s804_s17  ;;  %p813_p6 = scmp.lt.s32.totalorder %s804_s17, %s804_s17 }
  0x21   : > { %p807_p8 = pnand %p805_p10, %p1090_p13  ;;  %p814_p4 = por %p813_p6, %p812_p2 }
  0x23   : > { %p808_p1 = pneg %p807_p8 }
  0x25   : > { %p815_p9 = pnand %p814_p4, %p808_p1 }
  0x27   : > { %818 = shalt.err (!%p815_p9)
}
  0x28   : > { %718 = dma.hbm_to_vmem [thread:$0]  (!%p1074_p11), %s1294_s1, 64, %s183_s28, [#allocation7]  }
  0x29   : > { %s819_s9 = scalar_lea.hbm %s1295_s2, 512 }
  0x2a   : > { %p820_p8 = scmp.ne.s32.totalorder %s1295_s2, %s819_s9  ;;  %p826_p1 = scmp.lt.u32.totalorder %s819_s9, %s1295_s2 }
  0x2c   : > { %p822_p12 = pnand %p820_p8, %p1090_p13 }
  0x2e   : > { %p823_p2 = pneg %p822_p12 }
  0x30   : > { %p828_p4 = pnand %p826_p1, %p823_p2 }
  0x32   : > { %831 = shalt.err (!%p828_p4)
}
  0x33   : > { %s832_s28 = scalar_lea.vmem %s1078_s30, 512  ;;  %p840_p3 = scmp.lt.s32.totalorder %s1078_s30, %s1078_s30 }
  0x34   : > { %p833_p6 = scmp.ne.s32.totalorder %s1078_s30, %s832_s28  ;;  %p841_p5 = scmp.lt.s32.totalorder %s832_s28, %s832_s28 }
  0x36   : > { %p835_p9 = pnand %p833_p6, %p1090_p13  ;;  %p842_p7 = por %p841_p5, %p840_p3 }
  0x38   : > { %p836_p0 = pneg %p835_p9 }
  0x3a   : > { %p843_p10 = pnand %p842_p7, %p836_p0 }
  0x3c   : > { %846 = shalt.err (!%p843_p10)
}
  0x3d   : > { %s984_s15 = smov 128   ;;  %s985_s16 = smov 8  }
  0x3e   : > { %721 = dma.hbm_to_vmem [thread:$0]  (!%p1074_p11), %s1295_s2, 512, %s1078_s30, [#allocation7], %s984_s15, %s984_s15, %s985_s16  }
  0x3f   : > { %s847_s7 = scalar_lea.hbm %s1296_s3, 512 }
  0x40   : > { %p848_p8 = scmp.ne.s32.totalorder %s1296_s3, %s847_s7  ;;  %p854_p1 = scmp.lt.u32.totalorder %s847_s7, %s1296_s3 }
  0x42   : > { %p850_p12 = pnand %p848_p8, %p1090_p13 }
  0x44   : > { %p851_p2 = pneg %p850_p12 }
  0x46   : > { %p856_p4 = pnand %p854_p1, %p851_p2 }
  0x48   : > { %859 = shalt.err (!%p856_p4)
}
  0x49   : > { %s860_s13 = scalar_lea.vmem %s206_s8, 512  ;;  %p868_p3 = scmp.lt.s32.totalorder %s206_s8, %s206_s8 }
  0x4a   : > { %p861_p6 = scmp.ne.s32.totalorder %s206_s8, %s860_s13  ;;  %p869_p5 = scmp.lt.s32.totalorder %s860_s13, %s860_s13 }
  0x4c   : > { %p863_p9 = pnand %p861_p6, %p1090_p13  ;;  %p870_p7 = por %p869_p5, %p868_p3 }
  0x4e   : > { %p864_p0 = pneg %p863_p9 }
  0x50   : > { %p871_p10 = pnand %p870_p7, %p864_p0 }
  0x52   : > { %874 = shalt.err (!%p871_p10)
}
  0x53   : > { %724 = dma.hbm_to_vmem [thread:$0]  (!%p1074_p11), %s1296_s3, 512, %s206_s8, [#allocation10], %s984_s15, %s984_s15, %s985_s16  }
  0x54   : > { %s1149_s14 = sadd.s32 1, %s979_s21   ;;  %s30_s6 = sadd.s32 1, %s975_s20 }
  0x55   : > { %s27_s17 = ssub.s32 %s979_s21, %s1149_s14  ;;  %p37_p8 = scmp.ne.s32.totalorder %s975_s20, %s971_s19 }
  0x56   : > { %p28_p13 = scmp.eq.s32.totalorder %s27_s17, 0  ;;  %p38_p12 = scmp.eq.s32.totalorder %s979_s21, 0 }
  0x57   : > { %p736_p2 = scmp.lt.s32.totalorder %s979_s21, 8  ;;  %p1307_p4 = scmp.eq.s32.totalorder %s1046_s22, 7 }
  0x58   : > { %s1159_s23 = scalar_select %p28_p13, %s975_s20, %s30_s6  }
  0x59   : > { %p39_p1 = por %p38_p12, %p37_p8  ;;  %p1163_p6 = por %p1307_p4, %p37_p8 }
  0x5a   : > { %s219_s29 = sand.u32 1, %s975_s20   ;;  %s637_s7 = sshll.u32 %s979_s21, 6 }
  0x5b   : > { %s636_s8 = sshll.u32 %s219_s29, 2  ;;  %s1172_s9 = scalar_lea.hbm %s1293_s0, %s637_s7 }
  0x5c   : > { %s223_s10 = scalar_lea.vmem [#allocation3], %s636_s8  ;;  %p1174_p11 = pnand %p736_p2, %p39_p1 }
  0x5d   : > { %s230_s11 = sshll.u32 %s223_s10, 4  ;;  %s220_s13 = scalar_lea.sflag [#allocation4], %s219_s29  ;;  %s1178_s11 = int_to_ptr.vmem [resolvable:$true] %s230_s11 }
  0x5e   : > { %s875_s30 = scalar_lea.hbm %s1172_s9, 64  ;;  %p877_p0 = pneg %p1174_p11 }
  0x5f   : > { %p876_p9 = scmp.ne.s32.totalorder %s1172_s9, %s875_s30  ;;  %s880_s6 = scalar_lea.hbm %s1293_s0, 512 }
  0x60   : > { %p881_p7 = scmp.lt.u32.totalorder %s1172_s9, %s1293_s0  ;;  %p882_p10 = scmp.lt.u32.totalorder %s880_s6, %s875_s30 }
  0x61   : > { %p878_p3 = pnand %p877_p0, %p876_p9  ;;  %p884_p8 = scmp.lt.u32.totalorder %s875_s30, %s1172_s9 }
  0x62   : > { %p883_p13 = por %p882_p10, %p881_p7 }
  0x63   : > { %p879_p5 = pneg %p878_p3 }
  0x64   : > { %p885_p12 = por %p884_p8, %p883_p13 }
  0x66   : > { %p886_p2 = pnand %p885_p12, %p879_p5 }
  0x68   : > { %889 = shalt.err (!%p886_p2)
}
  0x69   : > { %s890_s29 = scalar_lea.vmem %s1178_s11, 64  ;;  %s986_s15 = smov [#allocation3]  }
  0x6a   : > { %p891_p1 = scmp.ne.s32.totalorder %s1178_s11, %s890_s29  ;;  %s895_s16 = sshll.u32 %s986_s15, 4  ;;  %s896_s16 = int_to_ptr.vmem [resolvable:$false] %s895_s16 }
  0x6b   : > { %s897_s10 = scalar_lea.vmem %s896_s16, 128  ;;  %p898_p3 = scmp.lt.s32.totalorder %s1178_s11, %s896_s16 }
  0x6c   : > { %p893_p4 = pnand %p891_p1, %p877_p0  ;;  %p899_p7 = scmp.lt.s32.totalorder %s897_s10, %s890_s29 }
  0x6e   : > { %p894_p9 = pneg %p893_p4  ;;  %p900_p10 = por %p899_p7, %p898_p3 }
  0x70   : > { %p901_p13 = pnand %p900_p10, %p894_p9 }
  0x72   : > { %904 = shalt.err (!%p901_p13)
}
  0x73   : > { %728 = dma.hbm_to_vmem [thread:$0]  (!%p1174_p11), %s1172_s9, 64, %s1178_s11, %s220_s13  }
  0x74   : > { %p1310_p5 = scmp.ne.s32.totalorder %s1304_s26, 0 }
  0x75   : > { %s1208_s30 = sand.u32 (!%p1310_p5), 1, %s971_s19   ;;  %p1311_p0 = scmp.ne.s32.totalorder (!%p1310_p5), %s1302_s24, 0 }
  0x76   : > { %245 = sbr.rel (%p1310_p5) target bundleno = 867 (0x363), region = 40  ;;  %s639_s28 = sshll.u32 (!%p1310_p5), %s1208_s30, 2 }
  0x77   : > { %s248_s17 = scalar_lea.sflag (!%p1310_p5), [#allocation4], %s1208_s30  ;;  %s1212_s6 = scalar_lea.vmem (!%p1310_p5), [#allocation3], %s639_s28 }
  0x7d   : > { %950 = dma.done.wait (%p1311_p0), %s248_s17, 64  }
  0x7e   : > { %952 = vsyncadd (%p1311_p0), %s248_s17, 4294967232  ;;  %p1312_p11 = scmp.eq.s32.totalorder %s1046_s22, 0 }
  0x80   : > { %954 = dma.done.wait (%p1312_p11), [#allocation7], 576   ;;  %p1313_p8 = pmov %p1312_p11 }
  0x82   : > { %956 = vsyncadd (%p1313_p8), [#allocation7], 4294966720  ;;  %p1314_p12 = pmov %p1313_p8 }
  0x83   : > { %p1315_p2 = pmov %p1313_p8 }
  0x84   : > { %958 = dma.done.wait (%p1314_p12), [#allocation10], 512  }
  0x85   : > { %960 = vsyncadd (%p1315_p2), [#allocation10], 4294966784  ;;  %p293_p1 = scmp.lt.s32.totalorder %s1046_s22, 7  ;;  %s1234_s12 = scalar_lea.vmem [#allocation11], %s639_s28 }
  0x86   : > { %p1316_p4 = scmp.ne.s32.totalorder %s1046_s22, 0 }
  0x87   : > { %s1228_s26 = scalar_select %p293_p1, %s1046_s22, 7 }
  0x88   : > { %299 = sbr.rel (%p1316_p4) target bundleno = 143 (0x8f), region = 60  ;;  %v300_v0 = vld [vmem:[#allocation6] sm:$0xf] (!%p1316_p4)  ;;  %vm301_vm0 = vcmask (!%p1316_p4), 257024  }
  0x89   : > { %s295_s11 = scalar_lea.vmem %s1297_s4, %s1228_s26  ;;  %302 = vst.msk [vmem:[#allocation2] sm:$0xf] (!%p1316_p4), %vm301_vm0, %v300_v0 }
  0x8f PF: > { %v309_v1 = vld [vmem:[#allocation9] sm:$0xff]  ;;  %v310_v2 = vld [vmem:[#allocation9 + $0x8] sm:$0xff]  ;;  %v987_v4 = vmov 0.0|0.0   ;;  %v311_v7 = vld [vmem:[#allocation9 + $0x10] sm:$0xff]  ;;  %vm391_vm1 = vcmask 1044480   ;;  %vm988_vm2 = vmmov 0  }
  0x90   : > { %v305_v3 = vld [vmem:[#allocation8] sm:$0xff]  ;;  %686 = vmatprep.subr.bf16.mxu0 %v987_v4  ;;  %692 = vmatprep.subr.bf16.mxu1 %v987_v4  ;;  %v687_v5 = vpack.c.bf16 %v310_v2, %v309_v1  ;;  %v306_v6 = vld [vmem:[#allocation8 + $0x8] sm:$0xff]  ;;  %v312_v8 = vld [vmem:[#allocation9 + $0x18] sm:$0xff]  ;;  %v989_v12 = vmov 0.0   ;;  %vm990_vm3 = vmmov 1   ;;  %vm313_vm5 = vcmask 261120  }
  0x91   : > { %v693_v9 = vpack.c.bf16 %v306_v6, %v305_v3  ;;  %v307_v10 = vld [vmem:[#allocation8 + $0x10] sm:$0xff]  ;;  %v308_v11 = vld [vmem:[#allocation8 + $0x18] sm:$0x1f]  ;;  %672 = vmatprep.mubr.msk.f32.mxu0 %vm988_vm2, %v989_v12  ;;  %683 = vmatprep.mubr.msk.f32.mxu1 %vm988_vm2, %v989_v12  ;;  %v690_v13 = vpack.c.bf16 %v312_v8, %v311_v7  ;;  %vm697_vm4 = vmpackc.low %vm391_vm1, %vm990_vm3  ;;  %vm387_vm6 = vcmask 236544   ;;  %s991_s8 = smov 32   ;;  %s992_s29 = smov 64  }
  0x92   : > { %688 = vmatpush3.bf16.msra.mxu0 %v687_v5  ;;  %v696_v14 = vpack.c.bf16 %v308_v11, %v307_v10  ;;  %v303_v15 = vld [vmem:[#allocation2] sm:$0xf]  ;;  %v304_v16 = vld [vmem:[%s1212_s6] sm:$0xf]  ;;  %s993_s15 = smov 96   ;;  %s651_s16 = sshll.u32 %s1046_s22, 6 }
  0x93   : > { %694 = vmatpush3.bf16.msra.mxu1 %v693_v9  ;;  %689 = vmatprep.subr.bf16.mxu0 %v987_v4  ;;  %v648_v19 = vld [vmem:[%s295_s11] ss:$0 sm:$0xff]  ;;  %s522_s10 = sshll.u32 %s1234_s12, 4  ;;  %vm505_vm7 = vcmask 257024   ;;  %s1249_s6 = scalar_lea.hbm %s1298_s5, %s651_s16  ;;  %s1251_s10 = int_to_ptr.vmem [resolvable:$true] %s522_s10 }
  0x94   : > { %695 = vmatprep.subr.bf16.mxu1 %v987_v4  ;;  %s509_s26 = scalar_lea.sflag [#allocation5], %s1208_s30  ;;  %s905_s24 = scalar_lea.vmem %s1251_s10, 64 }
  0x95   : > { %p906_p9 = scmp.ne.s32.totalorder %s1251_s10, %s905_s24  ;;  %s994_s22 = smov [#allocation11]  }
  0x96   : > { %691 = vmatpush3.bf16.msra.mxu0 %v690_v13  ;;  %s909_s9 = sshll.u32 %s994_s22, 4  ;;  %s910_s9 = int_to_ptr.vmem [resolvable:$false] %s909_s9 }
  0x97   : > { %698 = vmatpush3.bf16.msk.msra.mxu1 %vm697_vm4, %v696_v14  ;;  %p907_p3 = pnand %p906_p9, %p1163_p6  ;;  %s911_s11 = scalar_lea.vmem %s910_s9, 128 }
  0x98   : > { %p912_p10 = scmp.lt.s32.totalorder %s1251_s10, %s910_s9  ;;  %p913_p13 = scmp.lt.s32.totalorder %s911_s11, %s905_s24 }
  0x99   : > { %673 = vmatmul.mubr.msk.f32.vlgmr.msra.gmra.mrb[0].mxu0 %vm313_vm5, %v303_v15  ;;  %p908_p7 = pneg %p907_p3 }
  0x9a   : > { %684 = vmatmul.mubr.msk.f32.vlgmr.msra.gmra.mrb[0].mxu1 %vm387_vm6, %v304_v16  ;;  %p914_p5 = por %p913_p13, %p912_p10 }
  0x9c   : > { %p915_p0 = pnand %p914_p5, %p908_p7 }
 0x16c   : > { %v383_v17 = vpop.f32.mrb[0].mxu0 }
 0x16d   : > { %v461_v18 = vpop.f32.mrb[0].mxu1  ;;  %v674_v20 = vpop.f32.mrb[1].mxu0 }
 0x16e   : > { %v462_v21 = vadd.f32 %v461_v18, %v383_v17  ;;  %v685_v22 = vpop.f32.mrb[1].mxu1 }
 0x170   : > { %v472_v23 = vadd.f32 %v648_v19, %v462_v21 }
 0x172   : > { %480 = vrot.lane.b32.xlu0 %v472_v23, %s991_s8  ;;  %v649_v24 = vmul.f32 -1.442695, %v472_v23 }
 0x174   : > { %785 = vpow2.f32 %v649_v24 }
 0x17e   : > { %v786_v25 = vpop.eup %785 }
 0x17f   : > { %v476_v26 = vadd.f32 1.0, %v786_v25 }
 0x181   : > { %787 = vrcp.f32 %v476_v26 }
 0x18b   : > { %v788_v27 = vpop.eup %787 }
 0x18c   : > { %v490_v34 = vsub.f32 1.0, %v788_v27 }
 0x1e4   : > { %v481_v28 = vpop.permute.xlu0 %480 }
 0x1e5   : > { %v483_v29 = vmul.f32 %v788_v27, %v481_v28 }
 0x1e7   : > { %485 = vrot.lane.b32.xlu0 %v483_v29, %s992_s29 }
 0x259   : > { %v486_v30 = vpop.permute.xlu0 %485 }
 0x25a   : > { %v488_v31 = vadd.f32 %v486_v30, %v472_v23 }
 0x25c   : > { %789 = vtanh.f32 %v488_v31 }
 0x266   : > { %v790_v32 = vpop.eup %789 }
 0x267   : > { %492 = vrot.lane.b32.xlu1 %v790_v32, %s993_s15 }
 0x26b   : > { %496 = vrot.lane.b32.xlu1 %v303_v15, %s991_s8 }
 0x2d9   : > { %v493_v33 = vpop.permute.xlu1 %492 }
 0x2da   : > { %v495_v36 = vmul.f32 %v493_v33, %v490_v34 }
 0x2dd   : > { %v497_v35 = vpop.permute.xlu1 %496 }
 0x2de   : > { %v499_v37 = vmul.f32 %v788_v27, %v497_v35 }
 0x2e0   : > { %v500_v38 = vadd.f32 %v499_v37, %v495_v36 }
 0x2e2   : > { %502 = vrot.lane.b32.xlu0 %v500_v38, %s993_s15 }
 0x354   : > { %v503_v39 = vpop.permute.xlu0 %502 }
 0x355   : > { %506 = vst.msk [vmem:[#allocation2] sm:$0xf] %vm505_vm7, %v503_v39  ;;  %507 = vst.msk [vmem:[%s1234_s12] sm:$0xf] %vm505_vm7, %v503_v39 }
 0x356   : > { %918 = shalt.err (!%p915_p0)
}
 0x357   : > { %s919_s30 = scalar_lea.hbm %s1249_s6, 64  ;;  %s923_s7 = scalar_lea.hbm %s1298_s5, 512 }
 0x358   : > { %p920_p11 = scmp.ne.s32.totalorder %s1249_s6, %s919_s30  ;;  %p924_p2 = scmp.lt.u32.totalorder %s1249_s6, %s1298_s5 }
 0x359   : > { %p925_p1 = scmp.lt.u32.totalorder %s923_s7, %s919_s30  ;;  %p927_p9 = scmp.lt.u32.totalorder %s919_s30, %s1249_s6 }
 0x35a   : > { %p921_p8 = pnand %p920_p11, %p1163_p6 }
 0x35b   : > { %p926_p4 = por %p925_p1, %p924_p2 }
 0x35c   : > { %p922_p12 = pneg %p921_p8 }
 0x35d   : > { %p928_p3 = por %p927_p9, %p926_p4 }
 0x35f   : > { %p929_p7 = pnand %p928_p3, %p922_p12 }
 0x361   : > { %932 = shalt.err (!%p929_p7)
}
 0x362   : > { %713 = dma.vmem_to_hbm [thread:$0]  (%p1163_p6), %s1251_s10, 64, %s1249_s6, %s509_s26  }
 0x363 PF: > { %p740_p10 = scmp.ge.s32.totalorder %s979_s21, 2  ;;  %s534_s15 = sand.u32 1, %s967_s18  }
 0x364   : > { %p1317_p13 = scmp.ne.s32.totalorder %s1303_s25, 0  ;;  %s535_s16 = scalar_lea.sflag [#allocation5], %s534_s15 }
 0x366   : > { %p730_p5 = pnand %p740_p10, %p1317_p13 }
 0x368   : > { %962 = dma.done.wait (!%p730_p5), %s535_s16, 64  }
 0x369   : > { %964 = vsyncadd (!%p730_p5), %s535_s16, 4294967232  ;;  %p20_p0 = scmp.ge.s32.totalorder %s1149_s14, 10   ;;  %s1318_s18 = smov %s971_s19 }
 0x36a   : > { %s1319_s19 = smov %s975_s20  ;;  %s1320_s20 = smov %s1159_s23 }
 0x36b   : > { %s1321_s21 = smov %s1149_s14  ;;  %22 = sbr.rel (!%p20_p0) target bundleno = 7 (0x7), region = 104 }
 0x372   :  { %540 = vsyncpa [#allocation4], 1 }
 0x373   :  { %542 = vsyncpa [#allocation4 + $0x1], 1 }
 0x374   :  { %543 = vsyncpa [#allocation7], 1 }
 0x375   :  { %544 = vsyncpa [#allocation10], 1 }
 0x376   :  { %545 = vsyncpa [#allocation5], 1 }
 0x377   :  { %547 = vsyncpa [#allocation5 + $0x1], 1 }

</bundles_post_ra>
